<compile_context>
chip_gen: v7x
topology: tpu7x:2x2x1
jax: 0.10.0
libtpu: 0.0.40
codegen_flags: <defaults>
</compile_context>

<pallas_src>
import jax
import jax.numpy as jnp
from jax.experimental import pallas as pl
from jax.experimental.pallas import tpu as pltpu

LANES = 128
MAX_TILE_ROWS = 1024  # 1024 x 128 x f32 = 512 KiB per input block


def _round_up(x, m):
    return ((x + m - 1) // m) * m


def _make_masked_sse_kernel(num_rows, tile_rows, ragged):
    """num_rows / tile_rows / ragged are static Python values (closed over)."""

    def kernel(pred_ref, tgt_ref, out_ref, acc_sq, acc_cnt):
        i = pl.program_id(0)

        @pl.when(i == 0)
        def _init():
            acc_sq[...] = jnp.zeros_like(acc_sq)
            acc_cnt[...] = jnp.zeros_like(acc_cnt)

        # Load in native dtype, upcast in-register (required on v5e anyway,
        # which has no bf16 VPU path).
        t = tgt_ref[...].astype(jnp.float32)
        p = pred_ref[...].astype(jnp.float32)

        mask = t > 0.0
        if ragged:
            # The last block reads past the end of the array (unspecified
            # data) -> exclude those rows explicitly.  Only emitted when the
            # grid is actually ragged.
            row_idx = jax.lax.broadcasted_iota(jnp.int32, (tile_rows, LANES), 0)
            in_bounds = (i * tile_rows + row_idx) < num_rows
            mask = jnp.logical_and(mask, in_bounds)

        d = jnp.where(mask, t - p, 0.0)
        # Pure VPU elementwise accumulation into full-tile-shaped scratch;
        # no cross-lane/sublane movement inside the hot loop.
        acc_sq[...] += d * d
        acc_cnt[...] += mask.astype(jnp.float32)

        # One sublane (XLU) reduce for the whole kernel; single lane-dense
        # store of the two partial rows.
        @pl.when(i == pl.num_programs(0) - 1)
        def _finalize():
            out_ref[0:1, :] = jnp.sum(acc_sq[...], axis=0, keepdims=True)
            out_ref[1:2, :] = jnp.sum(acc_cnt[...], axis=0, keepdims=True)

    return kernel


def masked_rmse_loss(pred, target):
    assert pred.ndim == target.ndim, "inconsistent dimensions"
    assert pred.shape == target.shape

    pred_f = pred.reshape(-1)
    tgt_f = target.reshape(-1)
    n = pred_f.shape[0]

    # Bulk handled by the kernel: largest prefix that is a multiple of 128.
    n_lane = (n // LANES) * LANES
    rows = n_lane // LANES

    # Tail (< 128 elements): negligible, reduced in plain JAX (no pad copy).
    if n_lane < n:
        tail_t = tgt_f[n_lane:].astype(jnp.float32)
        tail_p = pred_f[n_lane:].astype(jnp.float32)
        tail_mask = tail_t > 0.0
        tail_d = jnp.where(tail_mask, tail_t - tail_p, 0.0)
        tail_sq = jnp.sum(tail_d * tail_d)
        tail_cnt = jnp.sum(tail_mask.astype(jnp.float32))
    else:
        tail_sq = jnp.float32(0.0)
        tail_cnt = jnp.float32(0.0)

    if rows == 0:
        # Entire input is smaller than one lane row; pure-JAX fallback.
        return jnp.sqrt(tail_sq / tail_cnt)

    pred2d = pred_f[:n_lane].reshape(rows, LANES)
    tgt2d = tgt_f[:n_lane].reshape(rows, LANES)

    # Big tiles for large inputs; exact (sublane-aligned) tile for small ones.
    tile_rows = min(MAX_TILE_ROWS, _round_up(rows, 8))
    grid = (pl.cdiv(rows, tile_rows),)
    ragged = (rows % tile_rows) != 0

    partials = pl.pallas_call(
        _make_masked_sse_kernel(rows, tile_rows, ragged),
        out_shape=jax.ShapeDtypeStruct((2, LANES), jnp.float32),
        grid_spec=pltpu.PrefetchScalarGridSpec(
            num_scalar_prefetch=0,
            grid=grid,
            in_specs=[
                pl.BlockSpec((tile_rows, LANES), lambda i: (i, 0)),
                pl.BlockSpec((tile_rows, LANES), lambda i: (i, 0)),
            ],
            out_specs=pl.BlockSpec((2, LANES), lambda i: (0, 0)),
            scratch_shapes=[
                pltpu.VMEM((tile_rows, LANES), jnp.float32),  # sum of squares
                pltpu.VMEM((tile_rows, LANES), jnp.float32),  # valid count
            ],
        ),
        compiler_params=pltpu.CompilerParams(
            dimension_semantics=("arbitrary",),
        ),
    )(pred2d, tgt2d)

    sum_sq = jnp.sum(partials[0]) + tail_sq
    cnt = jnp.sum(partials[1]) + tail_cnt
    return jnp.sqrt(sum_sq / cnt)


def _reference(pred, target):
    t = target.astype(jnp.float32)
    p = pred.astype(jnp.float32)
    mask = t > 0.0
    diff = jnp.where(mask, t - p, 0.0)
    return jnp.sqrt(jnp.sum(diff * diff) / jnp.sum(mask.astype(jnp.float32)))


if __name__ == "__main__":
    key = jax.random.PRNGKey(0)
    kp, kt = jax.random.split(key)

    # NCHW, matching the PyTorch convention.
    pred = jax.random.normal(kp, (2, 4, 16, 16), dtype=jnp.float32)
    # Mix of positive (valid) and non-positive (masked) targets.
    target = jax.random.normal(kt, (2, 4, 16, 16), dtype=jnp.float32)

    loss = masked_rmse_loss(pred, target)
    jax.block_until_ready(loss)
    ref = _reference(pred, target)
    assert jnp.allclose(loss, ref, rtol=1e-5, atol=1e-6), (loss, ref)

    # Second check: bf16 inputs, ragged shape (exercises the native-dtype
    # path, the ragged-last-block masking, and the <128-element JAX tail).
    kp2, kt2 = jax.random.split(jax.random.PRNGKey(0), 2)
    pred2 = jax.random.normal(kp2, (3, 5, 17, 13), dtype=jnp.bfloat16)
    target2 = jax.random.normal(kt2, (3, 5, 17, 13), dtype=jnp.bfloat16)

    loss2 = masked_rmse_loss(pred2, target2)
    jax.block_until_ready(loss2)
    ref2 = _reference(pred2, target2)
    assert jnp.allclose(loss2, ref2, rtol=1e-4, atol=1e-6), (loss2, ref2)

    print("KERNEL_OK")
</pallas_src>

<mosaic_0001>
module attributes {stable_mosaic.version = 11 : i64} {
  func.func @kernel(%arg0: i32, %arg1: memref<16x128xf32, #tpu.memory_space<vmem>>, %arg2: memref<16x128xf32, #tpu.memory_space<vmem>>, %arg3: memref<2x128xf32, #tpu.memory_space<vmem>>, %arg4: memref<16x128xf32, #tpu.memory_space<vmem>>, %arg5: memref<16x128xf32, #tpu.memory_space<vmem>>) attributes {dimension_semantics = [#tpu.dimension_semantics<arbitrary>], iteration_bounds = array<i64: 1>, scalar_prefetch = 0 : i64, scratch_operands = 2 : i64, tpu.core_type = #tpu.core_type<tc>, window_params = [{transform_indices = @transform_0, window_bounds = array<i64: 16, 128>}, {transform_indices = @transform_1, window_bounds = array<i64: 16, 128>}, {pipeline_mode = #tpu.pipeline_mode<synchronous>, transform_indices = @transform_2, window_bounds = array<i64: 2, 128>}]} {
    %c0_i32 = arith.constant 0 : i32
    %0 = arith.cmpi eq, %arg0, %c0_i32 : i32
    %1 = arith.extui %0 : i1 to i32
    %c0_i32_0 = arith.constant 0 : i32
    %2 = arith.cmpi ne, %1, %c0_i32_0 : i32
    scf.if %2 {
      %cst_15 = arith.constant 0.000000e+00 : f32
      %22 = vector.broadcast %cst_15 : f32 to vector<16x128xf32>
      %c0_16 = arith.constant 0 : index
      %c0_17 = arith.constant 0 : index
      %23 = vector.load %arg4[%c0_16, %c0_17] : memref<16x128xf32, #tpu.memory_space<vmem>>, vector<16x128xf32>
      tpu.vector_store %arg4[%c0_16, %c0_17], %22 {strides = array<i32>} : memref<16x128xf32, #tpu.memory_space<vmem>>, vector<16x128xf32>,
      %cst_18 = arith.constant 0.000000e+00 : f32
      %24 = vector.broadcast %cst_18 : f32 to vector<16x128xf32>
      %c0_19 = arith.constant 0 : index
      %c0_20 = arith.constant 0 : index
      %25 = vector.load %arg5[%c0_19, %c0_20] : memref<16x128xf32, #tpu.memory_space<vmem>>, vector<16x128xf32>
      tpu.vector_store %arg5[%c0_19, %c0_20], %24 {strides = array<i32>} : memref<16x128xf32, #tpu.memory_space<vmem>>, vector<16x128xf32>,
    } else {
    }
    %c0 = arith.constant 0 : index
    %c0_1 = arith.constant 0 : index
    %3 = vector.load %arg2[%c0, %c0_1] : memref<16x128xf32, #tpu.memory_space<vmem>>, vector<16x128xf32>
    %c0_2 = arith.constant 0 : index
    %c0_3 = arith.constant 0 : index
    %4 = vector.load %arg1[%c0_2, %c0_3] : memref<16x128xf32, #tpu.memory_space<vmem>>, vector<16x128xf32>
    %cst = arith.constant 0.000000e+00 : f32
    %5 = vector.broadcast %cst : f32 to vector<16x128xf32>
    %6 = arith.cmpf ogt, %3, %5 : vector<16x128xf32>
    %7 = arith.subf %3, %4 : vector<16x128xf32>
    %cst_4 = arith.constant 0.000000e+00 : f32
    %8 = vector.broadcast %cst_4 : f32 to vector<16x128xf32>
    %9 = arith.select %6, %7, %8 : vector<16x128xi1>, vector<16x128xf32>
    %c0_5 = arith.constant 0 : index
    %c0_6 = arith.constant 0 : index
    %10 = vector.load %arg4[%c0_5, %c0_6] : memref<16x128xf32, #tpu.memory_space<vmem>>, vector<16x128xf32>
    %11 = arith.mulf %9, %9 : vector<16x128xf32>
    %12 = arith.addf %10, %11 : vector<16x128xf32>
    %c0_7 = arith.constant 0 : index
    %c0_8 = arith.constant 0 : index
    %13 = vector.load %arg4[%c0_7, %c0_8] : memref<16x128xf32, #tpu.memory_space<vmem>>, vector<16x128xf32>
    tpu.vector_store %arg4[%c0_7, %c0_8], %12 {strides = array<i32>} : memref<16x128xf32, #tpu.memory_space<vmem>>, vector<16x128xf32>,
    %c0_9 = arith.constant 0 : index
    %c0_10 = arith.constant 0 : index
    %14 = vector.load %arg5[%c0_9, %c0_10] : memref<16x128xf32, #tpu.memory_space<vmem>>, vector<16x128xf32>
    %15 = arith.extui %6 : vector<16x128xi1> to vector<16x128xi32>
    %16 = arith.sitofp %15 : vector<16x128xi32> to vector<16x128xf32>
    %17 = arith.addf %14, %16 : vector<16x128xf32>
    %c0_11 = arith.constant 0 : index
    %c0_12 = arith.constant 0 : index
    %18 = vector.load %arg5[%c0_11, %c0_12] : memref<16x128xf32, #tpu.memory_space<vmem>>, vector<16x128xf32>
    tpu.vector_store %arg5[%c0_11, %c0_12], %17 {strides = array<i32>} : memref<16x128xf32, #tpu.memory_space<vmem>>, vector<16x128xf32>,
    %c0_i32_13 = arith.constant 0 : i32
    %19 = arith.cmpi eq, %arg0, %c0_i32_13 : i32
    %20 = arith.extui %19 : i1 to i32
    %c0_i32_14 = arith.constant 0 : i32
    %21 = arith.cmpi ne, %20, %c0_i32_14 : i32
    scf.if %21 {
      %c0_15 = arith.constant 0 : index
      %c0_16 = arith.constant 0 : index
      %22 = vector.load %arg4[%c0_15, %c0_16] : memref<16x128xf32, #tpu.memory_space<vmem>>, vector<16x128xf32>
      %cst_17 = arith.constant dense<0.000000e+00> : vector<128xf32>
      %23 = vector.multi_reduction <add>, %22, %cst_17 [0] : vector<16x128xf32> to vector<128xf32>
      %24 = vector.shape_cast %23 : vector<128xf32> to vector<1x128xf32>
      %c0_18 = arith.constant 0 : index
      %c0_19 = arith.constant 0 : index
      %25 = vector.load %arg3[%c0_18, %c0_19] : memref<2x128xf32, #tpu.memory_space<vmem>>, vector<1x128xf32>
      tpu.vector_store %arg3[%c0_18, %c0_19], %24 {strides = array<i32>} : memref<2x128xf32, #tpu.memory_space<vmem>>, vector<1x128xf32>,
      %c0_20 = arith.constant 0 : index
      %c0_21 = arith.constant 0 : index
      %26 = vector.load %arg5[%c0_20, %c0_21] : memref<16x128xf32, #tpu.memory_space<vmem>>, vector<16x128xf32>
      %cst_22 = arith.constant dense<0.000000e+00> : vector<128xf32>
      %27 = vector.multi_reduction <add>, %26, %cst_22 [0] : vector<16x128xf32> to vector<128xf32>
      %28 = vector.shape_cast %27 : vector<128xf32> to vector<1x128xf32>
      %c1 = arith.constant 1 : index
      %c0_23 = arith.constant 0 : index
      %29 = vector.load %arg3[%c1, %c0_23] : memref<2x128xf32, #tpu.memory_space<vmem>>, vector<1x128xf32>
      tpu.vector_store %arg3[%c1, %c0_23], %28 {strides = array<i32>} : memref<2x128xf32, #tpu.memory_space<vmem>>, vector<1x128xf32>,
    } else {
    }
    return
  }
  func.func @transform_0(%arg0: i32) -> (i32, i32) {
    %c0_i32 = arith.constant 0 : i32
    %c0_i32_0 = arith.constant 0 : i32
    return %arg0, %c0_i32 : i32, i32
  }
  func.func @transform_1(%arg0: i32) -> (i32, i32) {
    %c0_i32 = arith.constant 0 : i32
    %c0_i32_0 = arith.constant 0 : i32
    return %arg0, %c0_i32 : i32, i32
  }
  func.func @transform_2(%arg0: i32) -> (i32, i32) {
    %c0_i32 = arith.constant 0 : i32
    %c0_i32_0 = arith.constant 0 : i32
    %c0_i32_1 = arith.constant 0 : i32
    return %c0_i32, %c0_i32_0 : i32, i32
  }
}

</mosaic_0001>

<bundles_post_ra>
// kernel: tpu_custom_call.1
= control target key start
LH: loop header
LB: loop body
LE: loop exit
PB: predicated region body
PF: predicated region fallthrough
CT: control target
= control target key end

     0   :  { %7 = vsyncpa [#allocation5], 0  ;;  %s252_s0 = inlined_call_operand.hbm [shape: f32[16,128], index: 0, kind: input, shape index: {}]   ;;  %s253_s1 = inlined_call_operand.hbm [shape: f32[16,128], index: 1, kind: input, shape index: {}]   ;;  %s254_s2 = inlined_call_operand.hbm [shape: f32[2,128], index: 2, kind: output, shape index: {}]  }
   0x1   :  { %8 = vsyncpa [#allocation8], 0 }
   0x2   :  { %9 = vsyncpa [#allocation6], 0  ;;  %s195_s9 = smov [#allocation4]   ;;  %s123_s13 = scalar_lea.hbm %s252_s0, 256 }
   0x3   :  { %s15_s10 = sshll.u32 %s195_s9, 4  ;;  %p124_p0 = scmp.ne.s32.totalorder %s252_s0, %s123_s13  ;;  %s16_s10 = int_to_ptr.vmem [resolvable:$true] %s15_s10 }
   0x4   :  { %p127_p1 = scmp.lt.u32.totalorder %s123_s13, %s252_s0 }
   0x6   :  { %p129_p2 = pnand %p127_p1, %p124_p0 }
   0x8   :  { %132 = shalt.err (!%p129_p2)
}
   0x9   :  { %s133_s18 = scalar_lea.vmem %s16_s10, 256  ;;  %p138_p4 = scmp.lt.s32.totalorder %s16_s10, %s16_s10 }
   0xa   :  { %p134_p3 = scmp.ne.s32.totalorder %s16_s10, %s133_s18  ;;  %p139_p5 = scmp.lt.s32.totalorder %s133_s18, %s133_s18 }
   0xc   :  { %p140_p6 = por %p139_p5, %p138_p4 }
   0xe   :  { %p141_p7 = pnand %p140_p6, %p134_p3 }
  0x10   :  { %144 = shalt.err (!%p141_p7)
}
  0x11   :  { %s196_s19 = smov 128   ;;  %s197_s20 = smov 8  }
  0x12   :  { %21 = dma.hbm_to_vmem [thread:$0]  %s252_s0, 256, %s16_s10, [#allocation5], %s196_s19, %s196_s19, %s197_s20  }
  0x13   :  { %s198_s23 = smov [#allocation7]   ;;  %s145_s27 = scalar_lea.hbm %s253_s1, 256 }
  0x14   :  { %s27_s24 = sshll.u32 %s198_s23, 4  ;;  %p146_p8 = scmp.ne.s32.totalorder %s253_s1, %s145_s27  ;;  %s28_s24 = int_to_ptr.vmem [resolvable:$true] %s27_s24 }
  0x15   :  { %p149_p9 = scmp.lt.u32.totalorder %s145_s27, %s253_s1 }
  0x17   :  { %p151_p10 = pnand %p149_p9, %p146_p8 }
  0x19   :  { %154 = shalt.err (!%p151_p10)
}
  0x1a   :  { %s155_s4 = scalar_lea.vmem %s28_s24, 256  ;;  %p160_p12 = scmp.lt.s32.totalorder %s28_s24, %s28_s24 }
  0x1b   :  { %p156_p11 = scmp.ne.s32.totalorder %s28_s24, %s155_s4  ;;  %p161_p13 = scmp.lt.s32.totalorder %s155_s4, %s155_s4 }
  0x1d   :  { %p162_p0 = por %p161_p13, %p160_p12 }
  0x1f   :  { %p163_p1 = pnand %p162_p0, %p156_p11 }
  0x21   :  { %166 = shalt.err (!%p163_p1)
}
  0x22   :  { %33 = dma.hbm_to_vmem [thread:$0]  %s253_s1, 256, %s28_s24, [#allocation8], %s196_s19, %s196_s19, %s197_s20  }
  0x23   :  { %189 = dma.done.wait [#allocation5], 256  }
  0x24   :  { %190 = vsyncadd [#allocation5], 4294967040 }
  0x25   :  { %191 = dma.done.wait [#allocation8], 256  }
  0x26   :  { %192 = vsyncadd [#allocation8], 4294967040  ;;  %v48_v0 = vld [vmem:[#allocation7] sm:$0xff]  ;;  %v49_v1 = vld [vmem:[#allocation7 + $0x8] sm:$0xff]  ;;  %v199_v6 = vmov 0.0   ;;  %s200_s1 = smov [#allocation9]  }
  0x27   :  { %v50_v2 = vld [vmem:[#allocation4] sm:$0xff]  ;;  %v51_v3 = vld [vmem:[#allocation4 + $0x8] sm:$0xff]  ;;  %vm52_vm0 = vcmp.gt.f32.partialorder %v48_v0, 0.0  ;;  %vm53_vm1 = vcmp.gt.f32.partialorder %v49_v1, 0.0  ;;  %s105_s6 = sshll.u32 %s200_s1, 4  ;;  %s106_s6 = int_to_ptr.vmem [resolvable:$true] %s105_s6 }
  0x28   :  { %v54_v4 = vsub.f32 %v48_v0, %v50_v2  ;;  %v55_v5 = vsub.f32 %v49_v1, %v51_v3  ;;  %v115_v7 = vsel %vm52_vm0, 1.0, %v199_v6  ;;  %v116_v8 = vsel %vm53_vm1, 1.0, %v199_v6  ;;  %s167_s7 = scalar_lea.vmem %s106_s6, 32  ;;  %p172_p3 = scmp.lt.s32.totalorder %s106_s6, %s106_s6 }
  0x29   :  { %v91_v10 = vadd.f32 %v116_v8, %v115_v7  ;;  %p168_p2 = scmp.ne.s32.totalorder %s106_s6, %s167_s7  ;;  %p173_p4 = scmp.lt.s32.totalorder %s167_s7, %s167_s7 }
  0x2a   :  { %v56_v9 = vsel %vm52_vm0, %v54_v4, 0.0  ;;  %v57_v11 = vsel %vm53_vm1, %v55_v5, 0.0 }
  0x2b   :  { %v60_v12 = vmul.f32 %v56_v9, %v56_v9  ;;  %v61_v13 = vmul.f32 %v57_v11, %v57_v11  ;;  %v92_v14 = vrot.slane %v91_v10, 4  ;;  %p174_p5 = por %p173_p4, %p172_p3 }
  0x2d   :  { %v81_v15 = vadd.f32 %v61_v13, %v60_v12  ;;  %v93_v16 = vadd.f32 %v92_v14, %v91_v10  ;;  %p175_p6 = pnand %p174_p5, %p168_p2 }
  0x2f   :  { %v82_v17 = vrot.slane %v81_v15, 4  ;;  %v94_v18 = vrot.slane %v93_v16, 2 }
  0x31   :  { %v83_v19 = vadd.f32 %v82_v17, %v81_v15  ;;  %v95_v20 = vadd.f32 %v94_v18, %v93_v16 }
  0x33   :  { %v84_v21 = vrot.slane %v83_v19, 2  ;;  %v96_v22 = vrot.slane %v95_v20, 1 }
  0x35   :  { %v85_v23 = vadd.f32 %v84_v21, %v83_v19  ;;  %v97_v24 = vadd.f32 %v96_v22, %v95_v20 }
  0x37   :  { %v86_v25 = vrot.slane %v85_v23, 1  ;;  %98 = vst [vmem:[#allocation9 + $0x1] sm:$0x1] %v97_v24 }
  0x39   :  { %v87_v26 = vadd.f32 %v86_v25, %v85_v23 }
  0x3b   :  { %88 = vst [vmem:[#allocation9] sm:$0x1] %v87_v26 }
  0x3c   :  { %178 = shalt.err (!%p175_p6)
}
  0x3d   :  { %s179_s10 = scalar_lea.hbm %s254_s2, 32 }
  0x3e   :  { %p180_p7 = scmp.ne.s32.totalorder %s254_s2, %s179_s10  ;;  %p183_p8 = scmp.lt.u32.totalorder %s179_s10, %s254_s2 }
  0x40   :  { %p185_p9 = pnand %p183_p8, %p180_p7 }
  0x42   :  { %188 = shalt.err (!%p185_p9)
}
  0x43   :  { %108 = dma.vmem_to_hbm [thread:$0]  %s106_s6, 32, %s254_s2, [#allocation6]  }
  0x44   :  { %193 = dma.done.wait [#allocation6], 32  }
  0x45   :  { %194 = vsyncadd [#allocation6], 4294967264 }
  0x46   :  { %112 = vsyncpa [#allocation5], 1 }
  0x47   :  { %113 = vsyncpa [#allocation8], 1 }
  0x48   :  { %114 = vsyncpa [#allocation6], 1 }

</bundles_post_ra>
